<compile_context>
chip_gen: v6e
topology: v6e:2x2x1
jax: 0.10.0
libtpu: 0.0.40
codegen_flags: <defaults>
</compile_context>

<pallas_src>
import functools

import jax
import jax.numpy as jnp
from jax import lax
from jax.experimental import pallas as pl
from jax.experimental.pallas import tpu as pltpu

D_TRUE = 200      # feature dim fixed by the module (Linear(200, 200))
DP = 256          # lane / MXU aligned padded feature dim (zero padded)
HEAD_PAD = 128    # lane-dense padded head width (>= num_classes + 1)
NEG_SLOPE = 0.01  # F.leaky_relu default negative_slope
LN_EPS = 1e-6     # LayerNormalization default eps (added to std, torch-style)

# Row indices inside the single packed [PARAM_ROWS, DP] parameter input.
ROW_BM, ROW_GAMMA, ROW_BETA, ROW_WT, ROW_HEAD_BIAS = 0, 1, 2, 3, 4
PARAM_ROWS = 8    # padded to a full sublane tile


def _discriminator_kernel(ep_ref, cen_ref, wm_ref, prm_ref,
                          mid_ref, head_ref, x_ref, rhs_ref):
    """Fully fused Discriminator forward for one episode set (one grid step).

    ep_ref   : [1, B, 200]          episode vectors
    cen_ref  : [1, C, 200]          centroid matrix
    wm_ref   : [256, 256] bf16      spectral-normed fc_middle weight, (in, out), padded
    prm_ref  : [8, 256] f32         packed small params (bias/gamma/beta/wt/head-bias)
    mid_ref  : [1, B, 256]          padded middle_vec output (lane-dense)
    head_ref : [1, B, 128]          padded head output: [class_scores | logit_TF | 0]
    x_ref    : [R_PAD, 256] VMEM    concatenated + padded LHS slab
    rhs_ref  : [128, 256]   VMEM    padded head RHS: [centroid ; wt_row ; 0]
    """
    B = ep_ref.shape[1]
    C = cen_ref.shape[1]
    R = B + C
    R_PAD = x_ref.shape[0]

    p = prm_ref[...]
    bm = p[ROW_BM:ROW_BM + 1, :]
    gamma = p[ROW_GAMMA:ROW_GAMMA + 1, :]
    beta = p[ROW_BETA:ROW_BETA + 1, :]
    wt_row = p[ROW_WT:ROW_WT + 1, :]
    head_bias = p[ROW_HEAD_BIAS:ROW_HEAD_BIAS + 1, 0:HEAD_PAD]   # bt at column C

    # ---- build ONE padded, concatenated LHS slab in VMEM (fuses both paths) --
    # Zero only what the data copies below do not cover: the 128-aligned lane
    # tile [128:256) of every row (unmasked vst) and any padded trailing rows.
    x_ref[:, 128:DP] = jnp.zeros((R_PAD, DP - 128), jnp.float32)
    if R_PAD > R:
        x_ref[R:R_PAD, 0:128] = jnp.zeros((R_PAD - R, 128), jnp.float32)
    x_ref[0:B, 0:D_TRUE] = ep_ref[0]
    x_ref[B:R, 0:D_TRUE] = cen_ref[0]

    # ---- fc_middle (spectral-normalized) + LeakyReLU: one MXU weight push ----
    # bf16 operands, f32 accumulate (precision change vs torch f32 - flagged).
    xb = x_ref[...].astype(jnp.bfloat16)
    h = jnp.dot(xb, wm_ref[...], preferred_element_type=jnp.float32) + bm
    h = jnp.where(h >= 0, h, NEG_SLOPE * h)      # padded lanes stay exactly 0

    # ---- LayerNormalization: one-pass stats over the true 200 features ------
    # Padded lanes of h are exactly zero, so plain 256-lane sums are correct;
    # only the divisors use the true feature count.  torch.std is unbiased.
    s = jnp.sum(h, axis=-1, keepdims=True)
    sq = jnp.sum(h * h, axis=-1, keepdims=True)
    mu = s * (1.0 / D_TRUE)
    var = (sq - float(D_TRUE) * mu * mu) * (1.0 / (D_TRUE - 1))
    inv = pl.reciprocal(jnp.sqrt(var) + LN_EPS, approx=True)    # EUP slot, not VPU divide
    y = (h - mu) * inv * gamma + beta            # gamma/beta zero-padded -> padded lanes = 0

    middle = y[0:B, :]                           # [B, 256]
    centroid = y[B:R, :]                         # [C, 256]

    mid_ref[0] = middle                          # lane-dense (256) store

    # ---- merged head: ONE MXU call for class scores + TF logit --------------
    # RHS built in a padded scratch (no concat, no 17-row masked vreg work);
    # contract the last dim of both operands so no transpose is materialized.
    rhs_ref[...] = jnp.zeros((HEAD_PAD, DP), jnp.float32)
    rhs_ref[0:C, :] = centroid
    rhs_ref[C:C + 1, :] = wt_row
    head = lax.dot_general(middle, rhs_ref[...],
                           dimension_numbers=(((1,), (1,)), ((), ())),
                           preferred_element_type=jnp.float32)  # [B, HEAD_PAD]
    head_ref[0] = head + head_bias               # fc_TF bias folded via precomputed row


@jax.jit
def discriminator_forward_batched(ep_vecs, centroid_matrices, prep):
    """Batched forward over N episode sets.

    ep_vecs: [N, B, 200], centroid_matrices: [N, C, 200].
    Returns padded slabs (mid_pad [N, B, 256], head_pad [N, B, 128]) where
    head_pad[..., :C] are class scores, head_pad[..., C] is logit_TF, and the
    remaining columns are zero.  Latency-sensitive consumers should take these
    padded slabs directly (avoids per-call slicing ops).
    """
    N, B, _ = ep_vecs.shape
    _, C, _ = centroid_matrices.shape
    assert C + 1 <= HEAD_PAD <= DP
    R = B + C
    R_PAD = ((R + 7) // 8) * 8

    flops = N * (2 * R_PAD * DP * DP + 2 * B * HEAD_PAD * DP)
    transcendentals = N * R_PAD * 2
    bytes_accessed = (DP * DP * 2 + PARAM_ROWS * DP * 4
                      + N * (B * D_TRUE * 4 + C * D_TRUE * 4
                             + B * DP * 4 + B * HEAD_PAD * 4))

    grid_spec = pltpu.PrefetchScalarGridSpec(
        num_scalar_prefetch=0,
        grid=(N,),
        in_specs=[
            pl.BlockSpec((1, B, D_TRUE), lambda n: (n, 0, 0)),
            pl.BlockSpec((1, C, D_TRUE), lambda n: (n, 0, 0)),
            pl.BlockSpec((DP, DP), lambda n: (0, 0)),          # weight stays resident
            pl.BlockSpec((PARAM_ROWS, DP), lambda n: (0, 0)),  # packed params resident
        ],
        out_specs=(
            pl.BlockSpec((1, B, DP), lambda n: (n, 0, 0)),
            pl.BlockSpec((1, B, HEAD_PAD), lambda n: (n, 0, 0)),
        ),
        scratch_shapes=[
            pltpu.VMEM((R_PAD, DP), jnp.float32),       # concatenated LHS slab
            pltpu.VMEM((HEAD_PAD, DP), jnp.float32),    # padded head RHS
        ],
    )

    mid_pad, head_pad = pl.pallas_call(
        _discriminator_kernel,
        out_shape=(jax.ShapeDtypeStruct((N, B, DP), jnp.float32),
                   jax.ShapeDtypeStruct((N, B, HEAD_PAD), jnp.float32)),
        grid_spec=grid_spec,
        compiler_params=pltpu.CompilerParams(
            dimension_semantics=("parallel",)),   # shard episode sets across v7x TCs
        cost_estimate=pl.CostEstimate(flops=flops,
                                      transcendentals=transcendentals,
                                      bytes_accessed=bytes_accessed),
    )(ep_vecs, centroid_matrices, prep["wm_io"], prep["params_packed"])
    return mid_pad, head_pad


@jax.jit
def discriminator_forward(ep_vec, centroid_matrix, prep):
    """Single (ep_vec [B,200], centroid [C,200]) forward matching the torch
    module's return signature: (middle_vec, logit_TF, class_scores).
    The trailing slices are extra per-call XLA ops; latency-sensitive callers
    should consume the padded slabs from discriminator_forward_batched."""
    C = centroid_matrix.shape[0]
    mid_pad, head_pad = discriminator_forward_batched(
        ep_vec[None], centroid_matrix[None], prep)
    middle_vec = mid_pad[0, :, :D_TRUE]
    class_scores = head_pad[0, :, :C]
    logit_tf = head_pad[0, :, C:C + 1]
    return middle_vec, logit_tf, class_scores


def spectral_normalize(w, n_power_iters=5):
    """Deterministic spectral norm (power iteration) for a Linear weight [out, in].
    # TODO(synk): torch.nn.utils.spectral_norm keeps a random persistent `u`
    # updated once per forward; here sigma comes from a deterministic setup-time
    # power iteration (intentional deviation, outputs won't match torch bitwise).
    """
    out_dim, _ = w.shape
    u = jnp.ones((out_dim,), jnp.float32) / jnp.sqrt(out_dim)
    v = None
    for _ in range(n_power_iters):
        v = w.T @ u
        v = v / (jnp.linalg.norm(v) + 1e-12)
        u = w @ v
        u = u / (jnp.linalg.norm(u) + 1e-12)
    sigma = u @ (w @ v)
    return w / sigma


def init_params(key):
    k1, k2, k3, k4 = jax.random.split(key, 4)
    # nn.Linear default init: U(-1/sqrt(fan_in), 1/sqrt(fan_in))
    bound = 1.0 / jnp.sqrt(D_TRUE)
    wm = jax.random.uniform(k1, (D_TRUE, D_TRUE), jnp.float32, -bound, bound)  # [out, in]
    bm = jax.random.uniform(k2, (D_TRUE,), jnp.float32, -bound, bound)
    wt = jax.random.uniform(k3, (1, D_TRUE), jnp.float32, -bound, bound)       # [out, in]
    bt = jax.random.uniform(k4, (1,), jnp.float32, -bound, bound)
    wm = spectral_normalize(wm)
    wt = spectral_normalize(wt)
    gamma = jnp.ones((D_TRUE,), jnp.float32)   # LayerNormalization a_2
    beta = jnp.zeros((D_TRUE,), jnp.float32)   # LayerNormalization b_2
    return {"wm": wm, "bm": bm, "wt": wt, "bt": bt, "gamma": gamma, "beta": beta}


def prepare_params(params, num_classes):
    """One-time layout prep (NOT per forward call): transpose fc_middle to
    (in, out), zero-pad 200 -> 256, cast the big weight to bf16, and pack all
    small parameter tensors into ONE [8, 256] f32 array (single DMA)."""
    assert num_classes + 1 <= HEAD_PAD
    # NOTE: bf16 weight halves the dominant HBM->VMEM DMA and uses native MXU
    # bf16 passes; this is a precision change vs. the torch f32 reference.
    wm_io = (jnp.zeros((DP, DP), jnp.float32)
             .at[:D_TRUE, :D_TRUE].set(params["wm"].T)
             .astype(jnp.bfloat16))
    packed = jnp.zeros((PARAM_ROWS, DP), jnp.float32)
    packed = packed.at[ROW_BM, :D_TRUE].set(params["bm"])
    packed = packed.at[ROW_GAMMA, :D_TRUE].set(params["gamma"])
    packed = packed.at[ROW_BETA, :D_TRUE].set(params["beta"])
    packed = packed.at[ROW_WT, :D_TRUE].set(params["wt"][0])
    packed = packed.at[ROW_HEAD_BIAS, num_classes].set(params["bt"][0])
    return {"wm_io": wm_io, "params_packed": packed}


def _reference_forward(ep_vec, centroid_matrix, params):
    """Pure-JAX reference mirroring the kernel's numerics (bf16 weight, f32
    accumulate, unbiased std, eps on std) for a loose correctness check."""
    wm_bf16 = params["wm"].astype(jnp.bfloat16)

    def branch(x):
        h = jnp.dot(x.astype(jnp.bfloat16), wm_bf16.T,
                    preferred_element_type=jnp.float32) + params["bm"]
        h = jnp.where(h >= 0, h, NEG_SLOPE * h)
        mu = h.mean(-1, keepdims=True)
        std = jnp.sqrt(jnp.sum((h - mu) ** 2, -1, keepdims=True) / (D_TRUE - 1))
        return params["gamma"] * (h - mu) / (std + LN_EPS) + params["beta"]

    middle = branch(ep_vec)
    cen = branch(centroid_matrix)
    logit_tf = middle @ params["wt"].T + params["bt"]
    class_scores = middle @ cen.T
    return middle, logit_tf, class_scores


if __name__ == "__main__":
    key = jax.random.PRNGKey(0)
    kp, ke, kc = jax.random.split(key, 3)

    B = 8    # batch of episode vectors
    C = 16   # number of class centroids

    params = init_params(kp)
    prep = prepare_params(params, num_classes=C)   # setup-time padding/packing

    ep_vec = jax.random.normal(ke, (B, D_TRUE), jnp.float32)
    centroid_matrix = jax.random.normal(kc, (C, D_TRUE), jnp.float32)

    middle_vec, logit_tf, class_scores = discriminator_forward(
        ep_vec, centroid_matrix, prep)
    jax.block_until_ready((middle_vec, logit_tf, class_scores))

    assert middle_vec.shape == (B, D_TRUE)
    assert logit_tf.shape == (B, 1)
    assert class_scores.shape == (B, C)

    # Loose tolerance check vs a pure-JAX reference (approx reciprocal + MXU
    # rounding are the only remaining deltas).
    ref_mid, ref_tf, ref_cs = _reference_forward(ep_vec, centroid_matrix, params)
    assert bool(jnp.allclose(middle_vec, ref_mid, rtol=1e-1, atol=1e-1))
    assert bool(jnp.allclose(logit_tf, ref_tf, rtol=1e-1, atol=1e-1))
    assert bool(jnp.allclose(class_scores, ref_cs, rtol=1e-1, atol=1.0))

    # Exercise the batched / gridded path (shards across v7x TensorCores).
    ep_b = jnp.stack([ep_vec, ep_vec + 0.5])
    cen_b = jnp.stack([centroid_matrix, centroid_matrix - 0.5])
    mid_pad_b, head_pad_b = discriminator_forward_batched(ep_b, cen_b, prep)
    jax.block_until_ready((mid_pad_b, head_pad_b))
    assert mid_pad_b.shape == (2, B, DP)
    assert head_pad_b.shape == (2, B, HEAD_PAD)

    print("KERNEL_OK")
</pallas_src>

<mosaic_0001>
module attributes {stable_mosaic.version = 11 : i64} {
  func.func @_discriminator_kernel(%arg0: i32, %arg1: memref<1x8x200xf32, #tpu.memory_space<vmem>>, %arg2: memref<1x16x200xf32, #tpu.memory_space<vmem>>, %arg3: memref<256x256xbf16, #tpu.memory_space<vmem>>, %arg4: memref<8x256xf32, #tpu.memory_space<vmem>>, %arg5: memref<1x8x256xf32, #tpu.memory_space<vmem>>, %arg6: memref<1x8x128xf32, #tpu.memory_space<vmem>>, %arg7: memref<24x256xf32, #tpu.memory_space<vmem>>, %arg8: memref<128x256xf32, #tpu.memory_space<vmem>>) attributes {dimension_semantics = [#tpu.dimension_semantics<parallel>], iteration_bounds = array<i64: 1>, scalar_prefetch = 0 : i64, scratch_operands = 2 : i64, tpu.core_type = #tpu.core_type<tc>, window_params = [{transform_indices = @transform_0, window_bounds = array<i64: 1, 8, 200>}, {transform_indices = @transform_1, window_bounds = array<i64: 1, 16, 200>}, {pipeline_mode = #tpu.pipeline_mode<synchronous>, transform_indices = @transform_2, window_bounds = array<i64: 256, 256>}, {pipeline_mode = #tpu.pipeline_mode<synchronous>, transform_indices = @transform_3, window_bounds = array<i64: 8, 256>}, {transform_indices = @transform_4, window_bounds = array<i64: 1, 8, 256>}, {transform_indices = @transform_5, window_bounds = array<i64: 1, 8, 128>}]} {
    %c0 = arith.constant 0 : index
    %c0_0 = arith.constant 0 : index
    %0 = vector.load %arg4[%c0, %c0_0] : memref<8x256xf32, #tpu.memory_space<vmem>>, vector<8x256xf32>
    %1 = vector.extract_strided_slice %0 {offsets = [0, 0], sizes = [1, 256], strides = [1, 1]} : vector<8x256xf32> to vector<1x256xf32>
    %2 = vector.extract_strided_slice %0 {offsets = [1, 0], sizes = [1, 256], strides = [1, 1]} : vector<8x256xf32> to vector<1x256xf32>
    %3 = vector.extract_strided_slice %0 {offsets = [2, 0], sizes = [1, 256], strides = [1, 1]} : vector<8x256xf32> to vector<1x256xf32>
    %4 = vector.extract_strided_slice %0 {offsets = [3, 0], sizes = [1, 256], strides = [1, 1]} : vector<8x256xf32> to vector<1x256xf32>
    %5 = vector.extract_strided_slice %0 {offsets = [4, 0], sizes = [1, 128], strides = [1, 1]} : vector<8x256xf32> to vector<1x128xf32>
    %cst = arith.constant 0.000000e+00 : f32
    %6 = vector.broadcast %cst : f32 to vector<24x128xf32>
    %c0_1 = arith.constant 0 : index
    %c128 = arith.constant 128 : index
    %7 = vector.load %arg7[%c0_1, %c128] : memref<24x256xf32, #tpu.memory_space<vmem>>, vector<24x128xf32>
    tpu.vector_store %arg7[%c0_1, %c128], %6 {strides = array<i32>} : memref<24x256xf32, #tpu.memory_space<vmem>>, vector<24x128xf32>,
    %c0_2 = arith.constant 0 : index
    %c0_3 = arith.constant 0 : index
    %c0_4 = arith.constant 0 : index
    %8 = vector.load %arg1[%c0_2, %c0_3, %c0_4] : memref<1x8x200xf32, #tpu.memory_space<vmem>>, vector<1x8x200xf32>
    %9 = vector.shape_cast %8 : vector<1x8x200xf32> to vector<8x200xf32>
    %c0_5 = arith.constant 0 : index
    %c0_6 = arith.constant 0 : index
    %10 = vector.load %arg7[%c0_5, %c0_6] : memref<24x256xf32, #tpu.memory_space<vmem>>, vector<8x200xf32>
    tpu.vector_store %arg7[%c0_5, %c0_6], %9 {strides = array<i32>} : memref<24x256xf32, #tpu.memory_space<vmem>>, vector<8x200xf32>,
    %c0_7 = arith.constant 0 : index
    %c0_8 = arith.constant 0 : index
    %c0_9 = arith.constant 0 : index
    %11 = vector.load %arg2[%c0_7, %c0_8, %c0_9] : memref<1x16x200xf32, #tpu.memory_space<vmem>>, vector<1x16x200xf32>
    %12 = vector.shape_cast %11 : vector<1x16x200xf32> to vector<16x200xf32>
    %c8 = arith.constant 8 : index
    %c0_10 = arith.constant 0 : index
    %13 = vector.load %arg7[%c8, %c0_10] : memref<24x256xf32, #tpu.memory_space<vmem>>, vector<16x200xf32>
    tpu.vector_store %arg7[%c8, %c0_10], %12 {strides = array<i32>} : memref<24x256xf32, #tpu.memory_space<vmem>>, vector<16x200xf32>,
    %c0_11 = arith.constant 0 : index
    %c0_12 = arith.constant 0 : index
    %14 = vector.load %arg7[%c0_11, %c0_12] : memref<24x256xf32, #tpu.memory_space<vmem>>, vector<24x256xf32>
    %15 = arith.truncf %14 : vector<24x256xf32> to vector<24x256xbf16>
    %c0_13 = arith.constant 0 : index
    %c0_14 = arith.constant 0 : index
    %16 = vector.load %arg3[%c0_13, %c0_14] : memref<256x256xbf16, #tpu.memory_space<vmem>>, vector<256x256xbf16>
    %cst_15 = arith.constant dense<0.000000e+00> : vector<24x256xf32>
    %17 = tpu.matmul %15, %16, %cst_15 {dimension_numbers = #tpu.dot_dimension_numbers<[1], [0], [0], [1], [0, 0, 1, 1], [], []>} : vector<24x256xbf16>, vector<256x256xbf16>, vector<24x256xf32> -> vector<24x256xf32>
    %18 = vector.broadcast %1 : vector<1x256xf32> to vector<24x256xf32>
    %19 = arith.addf %17, %18 : vector<24x256xf32>
    %cst_16 = arith.constant 0.000000e+00 : f32
    %20 = vector.broadcast %cst_16 : f32 to vector<24x256xf32>
    %21 = arith.cmpf oge, %19, %20 : vector<24x256xf32>
    %cst_17 = arith.constant 0.00999999977 : f32
    %22 = vector.broadcast %cst_17 : f32 to vector<24x256xf32>
    %23 = arith.mulf %22, %19 : vector<24x256xf32>
    %24 = arith.select %21, %19, %23 : vector<24x256xi1>, vector<24x256xf32>
    %cst_18 = arith.constant dense<0.000000e+00> : vector<24xf32>
    %25 = vector.multi_reduction <add>, %24, %cst_18 [1] : vector<24x256xf32> to vector<24xf32>
    %26 = vector.shape_cast %25 : vector<24xf32> to vector<24x1xf32>
    %27 = arith.mulf %24, %24 : vector<24x256xf32>
    %cst_19 = arith.constant dense<0.000000e+00> : vector<24xf32>
    %28 = vector.multi_reduction <add>, %27, %cst_19 [1] : vector<24x256xf32> to vector<24xf32>
    %29 = vector.shape_cast %28 : vector<24xf32> to vector<24x1xf32>
    %cst_20 = arith.constant 5.000000e-03 : f32
    %30 = vector.broadcast %cst_20 : f32 to vector<24x1xf32>
    %31 = arith.mulf %26, %30 : vector<24x1xf32>
    %cst_21 = arith.constant 2.000000e+02 : f32
    %32 = vector.broadcast %cst_21 : f32 to vector<24x1xf32>
    %33 = arith.mulf %32, %31 : vector<24x1xf32>
    %34 = arith.mulf %33, %31 : vector<24x1xf32>
    %35 = arith.subf %29, %34 : vector<24x1xf32>
    %cst_22 = arith.constant 0.00502512557 : f32
    %36 = vector.broadcast %cst_22 : f32 to vector<24x1xf32>
    %37 = arith.mulf %35, %36 : vector<24x1xf32>
    %38 = math.sqrt %37 : vector<24x1xf32>
    %cst_23 = arith.constant 9.99999997E-7 : f32
    %39 = vector.broadcast %cst_23 : f32 to vector<24x1xf32>
    %40 = arith.addf %38, %39 : vector<24x1xf32>
    %41 = tpu.reciprocal %40 {approx = true} : vector<24x1xf32> -> vector<24x1xf32>
    %42 = vector.broadcast %31 : vector<24x1xf32> to vector<24x256xf32>
    %43 = arith.subf %24, %42 : vector<24x256xf32>
    %44 = vector.broadcast %41 : vector<24x1xf32> to vector<24x256xf32>
    %45 = arith.mulf %43, %44 : vector<24x256xf32>
    %46 = vector.broadcast %2 : vector<1x256xf32> to vector<24x256xf32>
    %47 = arith.mulf %45, %46 : vector<24x256xf32>
    %48 = vector.broadcast %3 : vector<1x256xf32> to vector<24x256xf32>
    %49 = arith.addf %47, %48 : vector<24x256xf32>
    %50 = vector.extract_strided_slice %49 {offsets = [0, 0], sizes = [8, 256], strides = [1, 1]} : vector<24x256xf32> to vector<8x256xf32>
    %51 = vector.extract_strided_slice %49 {offsets = [8, 0], sizes = [16, 256], strides = [1, 1]} : vector<24x256xf32> to vector<16x256xf32>
    %c0_24 = arith.constant 0 : index
    %c0_25 = arith.constant 0 : index
    %c0_26 = arith.constant 0 : index
    %52 = vector.load %arg5[%c0_24, %c0_25, %c0_26] : memref<1x8x256xf32, #tpu.memory_space<vmem>>, vector<1x8x256xf32>
    %53 = vector.shape_cast %52 : vector<1x8x256xf32> to vector<8x256xf32>
    %54 = vector.shape_cast %50 : vector<8x256xf32> to vector<1x8x256xf32>
    tpu.vector_store %arg5[%c0_24, %c0_25, %c0_26], %54 {strides = array<i32>} : memref<1x8x256xf32, #tpu.memory_space<vmem>>, vector<1x8x256xf32>,
    %cst_27 = arith.constant 0.000000e+00 : f32
    %55 = vector.broadcast %cst_27 : f32 to vector<128x256xf32>
    %c0_28 = arith.constant 0 : index
    %c0_29 = arith.constant 0 : index
    %56 = vector.load %arg8[%c0_28, %c0_29] : memref<128x256xf32, #tpu.memory_space<vmem>>, vector<128x256xf32>
    tpu.vector_store %arg8[%c0_28, %c0_29], %55 {strides = array<i32>} : memref<128x256xf32, #tpu.memory_space<vmem>>, vector<128x256xf32>,
    %c0_30 = arith.constant 0 : index
    %c0_31 = arith.constant 0 : index
    %57 = vector.load %arg8[%c0_30, %c0_31] : memref<128x256xf32, #tpu.memory_space<vmem>>, vector<16x256xf32>
    tpu.vector_store %arg8[%c0_30, %c0_31], %51 {strides = array<i32>} : memref<128x256xf32, #tpu.memory_space<vmem>>, vector<16x256xf32>,
    %c16 = arith.constant 16 : index
    %c0_32 = arith.constant 0 : index
    %58 = vector.load %arg8[%c16, %c0_32] : memref<128x256xf32, #tpu.memory_space<vmem>>, vector<1x256xf32>
    tpu.vector_store %arg8[%c16, %c0_32], %4 {strides = array<i32>} : memref<128x256xf32, #tpu.memory_space<vmem>>, vector<1x256xf32>,
    %c0_33 = arith.constant 0 : index
    %c0_34 = arith.constant 0 : index
    %59 = vector.load %arg8[%c0_33, %c0_34] : memref<128x256xf32, #tpu.memory_space<vmem>>, vector<128x256xf32>
    %cst_35 = arith.constant dense<0.000000e+00> : vector<8x128xf32>
    %60 = tpu.matmul %50, %59, %cst_35 {dimension_numbers = #tpu.dot_dimension_numbers<[1], [1], [0], [0], [0, 0, 1, 0], [], []>} : vector<8x256xf32>, vector<128x256xf32>, vector<8x128xf32> -> vector<8x128xf32>
    %61 = vector.broadcast %5 : vector<1x128xf32> to vector<8x128xf32>
    %62 = arith.addf %60, %61 : vector<8x128xf32>
    %c0_36 = arith.constant 0 : index
    %c0_37 = arith.constant 0 : index
    %c0_38 = arith.constant 0 : index
    %63 = vector.load %arg6[%c0_36, %c0_37, %c0_38] : memref<1x8x128xf32, #tpu.memory_space<vmem>>, vector<1x8x128xf32>
    %64 = vector.shape_cast %63 : vector<1x8x128xf32> to vector<8x128xf32>
    %65 = vector.shape_cast %62 : vector<8x128xf32> to vector<1x8x128xf32>
    tpu.vector_store %arg6[%c0_36, %c0_37, %c0_38], %65 {strides = array<i32>} : memref<1x8x128xf32, #tpu.memory_space<vmem>>, vector<1x8x128xf32>,
    return
  }
  func.func @transform_0(%arg0: i32) -> (i32, i32, i32) {
    %c0_i32 = arith.constant 0 : i32
    %c0_i32_0 = arith.constant 0 : i32
    %c0_i32_1 = arith.constant 0 : i32
    return %arg0, %c0_i32, %c0_i32_0 : i32, i32, i32
  }
  func.func @transform_1(%arg0: i32) -> (i32, i32, i32) {
    %c0_i32 = arith.constant 0 : i32
    %c0_i32_0 = arith.constant 0 : i32
    %c0_i32_1 = arith.constant 0 : i32
    return %arg0, %c0_i32, %c0_i32_0 : i32, i32, i32
  }
  func.func @transform_2(%arg0: i32) -> (i32, i32) {
    %c0_i32 = arith.constant 0 : i32
    %c0_i32_0 = arith.constant 0 : i32
    %c0_i32_1 = arith.constant 0 : i32
    return %c0_i32, %c0_i32_0 : i32, i32
  }
  func.func @transform_3(%arg0: i32) -> (i32, i32) {
    %c0_i32 = arith.constant 0 : i32
    %c0_i32_0 = arith.constant 0 : i32
    %c0_i32_1 = arith.constant 0 : i32
    return %c0_i32, %c0_i32_0 : i32, i32
  }
  func.func @transform_4(%arg0: i32) -> (i32, i32, i32) {
    %c0_i32 = arith.constant 0 : i32
    %c0_i32_0 = arith.constant 0 : i32
    %c0_i32_1 = arith.constant 0 : i32
    return %arg0, %c0_i32, %c0_i32_0 : i32, i32, i32
  }
  func.func @transform_5(%arg0: i32) -> (i32, i32, i32) {
    %c0_i32 = arith.constant 0 : i32
    %c0_i32_0 = arith.constant 0 : i32
    %c0_i32_1 = arith.constant 0 : i32
    return %arg0, %c0_i32, %c0_i32_0 : i32, i32, i32
  }
}

</mosaic_0001>

<bundles_post_ra>
// kernel: discriminator_forward_batched.1
= control target key start
LH: loop header
LB: loop body
LE: loop exit
PB: predicated region body
PF: predicated region fallthrough
CT: control target
= control target key end

     0   :  { %11 = vsyncpa [#allocation5], 0  ;;  %s1075_s0 = inlined_call_operand.hbm [shape: f32[1,8,200], index: 0, kind: input, shape index: {}]   ;;  %s1076_s1 = inlined_call_operand.hbm [shape: f32[1,16,200], index: 1, kind: input, shape index: {}]   ;;  %s1077_s2 = inlined_call_operand.hbm [shape: bf16[256,256], index: 2, kind: input, shape index: {}]   ;;  %s1078_s3 = inlined_call_operand.hbm [shape: f32[8,256], index: 3, kind: input, shape index: {}]   ;;  %s1079_s4 = inlined_call_operand.hbm [shape: f32[1,8,256], index: 4, kind: output, shape index: {0}]   ;;  %s1080_s5 = inlined_call_operand.hbm [shape: f32[1,8,128], index: 5, kind: output, shape index: {1}]  }
   0x1   :  { %12 = vsyncpa [#allocation8], 0 }
   0x2   :  { %13 = vsyncpa [#allocation11], 0 }
   0x3   :  { %14 = vsyncpa [#allocation6], 0 }
   0x4   :  { %15 = vsyncpa [#allocation14], 0  ;;  %s913_s18 = smov [#allocation7]  }
   0x5   :  { %s31_s19 = sshll.u32 %s913_s18, 4  ;;  %s32_s19 = int_to_ptr.vmem [resolvable:$true] %s31_s19 }
   0x6   :  { %s791_s20 = scalar_lea.vmem %s32_s19, 512  ;;  %p796_p1 = scmp.lt.s32.totalorder %s32_s19, %s32_s19 }
   0x7   :  { %p792_p0 = scmp.ne.s32.totalorder %s32_s19, %s791_s20  ;;  %p797_p2 = scmp.lt.s32.totalorder %s791_s20, %s791_s20 }
   0x9   :  { %p798_p3 = por %p797_p2, %p796_p1 }
   0xb   :  { %p799_p4 = pnand %p798_p3, %p792_p0 }
   0xd   :  { %802 = shalt.err (!%p799_p4)
}
   0xe   :  { %s914_s21 = smov 256   ;;  %s915_s22 = smov 16  }
   0xf   :  { %37 = dma.hbm_to_vmem [thread:$0]  %s1076_s1, 512, %s32_s19, [#allocation8], %s914_s21, %s914_s21, %s915_s22  }
  0x10   :  { %s916_s25 = smov [#allocation4]   ;;  %s917_s27 = smov [#allocation9]  }
  0x11   :  { %s22_s26 = sshll.u32 %s916_s25, 4  ;;  %s43_s28 = sshll.u32 %s917_s27, 4  ;;  %s23_s26 = int_to_ptr.vmem [resolvable:$true] %s22_s26  ;;  %s44_s28 = int_to_ptr.vmem [resolvable:$true] %s43_s28 }
  0x12   :  { %s811_s29 = scalar_lea.vmem %s23_s26, 256  ;;  %p816_p6 = scmp.lt.s32.totalorder %s23_s26, %s23_s26 }
  0x13   :  { %p812_p5 = scmp.ne.s32.totalorder %s23_s26, %s811_s29  ;;  %p817_p7 = scmp.lt.s32.totalorder %s811_s29, %s811_s29 }
  0x15   :  { %p818_p8 = por %p817_p7, %p816_p6 }
  0x17   :  { %p819_p9 = pnand %p818_p8, %p812_p5 }
  0x19   :  { %822 = shalt.err (!%p819_p9)
}
  0x1a   :  { %25 = dma.hbm_to_vmem [thread:$0]  %s1075_s0, 256, %s23_s26, [#allocation5]  }
  0x1b   :  { %s831_s7 = scalar_lea.vmem %s44_s28, 4096  ;;  %p836_p11 = scmp.lt.s32.totalorder %s44_s28, %s44_s28 }
  0x1c   :  { %p832_p10 = scmp.ne.s32.totalorder %s44_s28, %s831_s7  ;;  %p837_p12 = scmp.lt.s32.totalorder %s831_s7, %s831_s7 }
  0x1e   :  { %p838_p13 = por %p837_p12, %p836_p11 }
  0x20   :  { %p839_p0 = pnand %p838_p13, %p832_p10 }
  0x22   :  { %842 = shalt.err (!%p839_p0)
}
  0x23   :  { %s918_s1 = smov 128   ;;  %s919_s8 = smov 8  }
  0x24   :  { %49 = dma.hbm_to_vmem [thread:$0]  %s1077_s2, 4096, %s44_s28, [#allocation8], %s918_s1, %s918_s1, %s919_s8  }
  0x25   :  { %s920_s11 = smov [#allocation10]  }
  0x26   :  { %s56_s12 = sshll.u32 %s920_s11, 4  ;;  %s57_s12 = int_to_ptr.vmem [resolvable:$true] %s56_s12 }
  0x27   :  { %s851_s13 = scalar_lea.vmem %s57_s12, 256  ;;  %p856_p2 = scmp.lt.s32.totalorder %s57_s12, %s57_s12 }
  0x28   :  { %p852_p1 = scmp.ne.s32.totalorder %s57_s12, %s851_s13  ;;  %p857_p3 = scmp.lt.s32.totalorder %s851_s13, %s851_s13 }
  0x2a   :  { %p858_p4 = por %p857_p3, %p856_p2 }
  0x2c   :  { %p859_p5 = pnand %p858_p4, %p852_p1 }
  0x2e   :  { %862 = shalt.err (!%p859_p5)
}
  0x2f   :  { %59 = dma.hbm_to_vmem [thread:$0]  %s1078_s3, 256, %s57_s12, [#allocation11]  }
  0x30   :  { %903 = dma.done.wait [#allocation5], 256  }
  0x31   :  { %904 = vsyncadd [#allocation5], 4294967040 }
  0x32   :  { %905 = dma.done.wait [#allocation8], 4608  }
  0x33   :  { %906 = vsyncadd [#allocation8], 4294962688 }
  0x34   :  { %907 = dma.done.wait [#allocation11], 256  }
  0x35   :  { %908 = vsyncadd [#allocation11], 4294967040  ;;  %v921_v0 = vmov 0.0   ;;  %v722_v1 = vld [vmem:[#allocation9 + $0x74] ss:$8 sps:$4 sm:$0xff]   ;;  %vm80_vm0 = vcmask 588800   ;;  %v132_v46 = vlaneseq }
  0x36   :  { %74 = vst [vmem:[#allocation2 + $0x8] sm:$0xff] %v921_v0  ;;  %75 = vst [vmem:[#allocation2 + $0x18] sm:$0xff] %v921_v0  ;;  %576 = vmatprep.subr.mxu1 %v921_v0  ;;  %v724_v2 = vld [vmem:[#allocation9 + $0x70] ss:$8 sps:$4 sm:$0xff]   ;;  %300 = vmatprep.subr.bf16.mxu0 %v722_v1  ;;  %v725_v3 = vld [vmem:[#allocation9 + $0x64] ss:$8 sps:$4 sm:$0xff]  }
  0x37   :  { %76 = vst [vmem:[#allocation2 + $0x28] sm:$0xff] %v921_v0  ;;  %481 = vst [vmem:[#allocation3 + $0x20] sm:$0xff] %v921_v0  ;;  %577 = vmatpush1.xpose.msra.mxu1 %v921_v0  ;;  %301 = vmatpush1.bf16.msra.mxu0 %v724_v2  ;;  %v727_v4 = vld [vmem:[#allocation9 + $0x60] ss:$8 sps:$4 sm:$0xff]   ;;  %v728_v5 = vld [vmem:[#allocation9 + $0x54] ss:$8 sps:$4 sm:$0xff]  }
  0x38   :  { %482 = vst [vmem:[#allocation3 + $0x28] sm:$0xff] %v921_v0  ;;  %578 = vmatprep.subr.mxu1 %v921_v0  ;;  %302 = vmatprep.subr.bf16.mxu0 %v725_v3  ;;  %v730_v6 = vld [vmem:[#allocation9 + $0x50] ss:$8 sps:$4 sm:$0xff]   ;;  %v731_v7 = vld [vmem:[#allocation9 + $0x44] ss:$8 sps:$4 sm:$0xff]   ;;  %v1005_v51 = vshrl.u32 %v132_v46, 7 }
  0x39   :  { %v733_v8 = vld [vmem:[#allocation9 + $0x40] ss:$8 sps:$4 sm:$0xff]   ;;  %v734_v9 = vld [vmem:[#allocation9 + $0x34] ss:$8 sps:$4 sm:$0xff]   ;;  %v736_v10 = vld [vmem:[#allocation9 + $0x30] ss:$8 sps:$4 sm:$0xff]  }
  0x3a   :  { %v737_v11 = vld [vmem:[#allocation9 + $0x24] ss:$8 sps:$4 sm:$0xff]   ;;  %v739_v12 = vld [vmem:[#allocation9 + $0x20] ss:$8 sps:$4 sm:$0xff]   ;;  %v740_v13 = vld [vmem:[#allocation9 + $0x14] ss:$8 sps:$4 sm:$0xff]  }
  0x3b   :  { %579 = vmatpush1.xpose.msra.mxu1 %v921_v0  ;;  %303 = vmatpush1.bf16.msra.mxu0 %v727_v4  ;;  %v78_v14 = vld [vmem:[#allocation4 + $0x8] sm:$0xff]  ;;  %v83_v15 = vld [vmem:[#allocation7 + $0x8] sm:$0xff]  ;;  %v987_v16 = vld [vmem:[#allocation4] sm:$0xff]  ;;  %v922_v47 = vmov 1966171168   ;;  %vm535_vm1 = vcmp.lt.s32.totalorder %v132_v46, 256 }
  0x3c   :  { %580 = vmatprep.subr.mxu1 %v921_v0  ;;  %304 = vmatprep.subr.bf16.mxu0 %v728_v5  ;;  %81 = vst.msk [vmem:[#allocation2 + $0x8] sm:$0xff] %vm80_vm0, %v78_v14  ;;  %87 = vst.msk [vmem:[#allocation2 + $0x18] sm:$0xff] %vm80_vm0, %v83_v15  ;;  %v82_v17 = vld [vmem:[#allocation7] sm:$0xff]  ;;  %v85_v18 = vld [vmem:[#allocation7 + $0x18] sm:$0xff]  ;;  %v517_v48 = vunpack.c.l.s4 %v922_v47  ;;  %v134_v61 = vsub.s32 0, %v1005_v51  ;;  %s923_s2 = smov [#allocation12]  }
  0x3d   :  { %v742_v19 = vld [vmem:[#allocation9 + $0x10] ss:$8 sps:$4 sm:$0xff]   ;;  %89 = vst.msk [vmem:[#allocation2 + $0x28] sm:$0xff] %vm80_vm0, %v85_v18  ;;  %v743_v21 = vld [vmem:[#allocation9 + $0x4] ss:$8 sps:$4 sm:$0xff]   ;;  %v96_v43 = vpack.c.bf16 %v82_v17, %v987_v16  ;;  %s653_s3 = sshll.u32 %s923_s2, 4  ;;  %s654_s3 = int_to_ptr.vmem [resolvable:$true] %s653_s3 }
  0x3e   :  { %v84_v20 = vld [vmem:[#allocation7 + $0x10] sm:$0xff]  ;;  %v745_v22 = vld [vmem:[#allocation9] ss:$8 sps:$4 sm:$0xff]   ;;  %v749_v28 = vld [vmem:[#allocation9 + $0xe4] ss:$8 sps:$4 sm:$0xff]   ;;  %v518_v53 = vunpack.c.0.s8 %v517_v48  ;;  %s863_s15 = scalar_lea.vmem %s654_s3, 256  ;;  %p868_p7 = scmp.lt.s32.totalorder %s654_s3, %s654_s3 }
  0x3f   :  { %581 = vmatpush1.xpose.msra.mxu1 %v921_v0  ;;  %305 = vmatpush1.bf16.msra.mxu0 %v730_v6  ;;  %v746_v23 = vld [vmem:[#allocation9 + $0xf4] ss:$8 sps:$4 sm:$0xff]   ;;  %v748_v27 = vld [vmem:[#allocation9 + $0xf0] ss:$8 sps:$4 sm:$0xff]   ;;  %v751_v29 = vld [vmem:[#allocation9 + $0xe0] ss:$8 sps:$4 sm:$0xff]   ;;  %v98_v45 = vpack.c.bf16 %v84_v20, %v84_v20  ;;  %p864_p6 = scmp.ne.s32.totalorder %s654_s3, %s863_s15  ;;  %p869_p8 = scmp.lt.s32.totalorder %s863_s15, %s863_s15 }
  0x40   :  { %582 = vmatprep.subr.mxu1 %v921_v0  ;;  %306 = vmatprep.subr.bf16.mxu0 %v731_v7  ;;  %v752_v30 = vld [vmem:[#allocation9 + $0xd4] ss:$8 sps:$4 sm:$0xff]   ;;  %v754_v31 = vld [vmem:[#allocation9 + $0xd0] ss:$8 sps:$4 sm:$0xff]   ;;  %v755_v32 = vld [vmem:[#allocation9 + $0xc4] ss:$8 sps:$4 sm:$0xff]   ;;  %v521_v54 = vsub.s32 %v518_v53, %v1005_v51 }
  0x41   :  { %v757_v33 = vld [vmem:[#allocation9 + $0xc0] ss:$8 sps:$4 sm:$0xff]   ;;  %v758_v34 = vld [vmem:[#allocation9 + $0xb4] ss:$8 sps:$4 sm:$0xff]   ;;  %v760_v35 = vld [vmem:[#allocation9 + $0xb0] ss:$8 sps:$4 sm:$0xff]   ;;  %p870_p9 = por %p869_p8, %p868_p7 }
  0x42   :  { %v761_v36 = vld [vmem:[#allocation9 + $0xa4] ss:$8 sps:$4 sm:$0xff]   ;;  %v763_v37 = vld [vmem:[#allocation9 + $0xa0] ss:$8 sps:$4 sm:$0xff]   ;;  %v764_v38 = vld [vmem:[#allocation9 + $0x94] ss:$8 sps:$4 sm:$0xff]  }
  0x43   :  { %583 = vmatpush1.xpose.msra.mxu1 %v921_v0  ;;  %307 = vmatpush1.bf16.msra.mxu0 %v733_v8  ;;  %v91_v24 = vld [vmem:[#allocation2 + $0x8] sm:$0xff]  ;;  %v93_v25 = vld [vmem:[#allocation2 + $0x18] sm:$0xff]  ;;  %v1001_v49 = vld [vmem:[#allocation10] sm:$0xff]  ;;  %p871_p10 = pnand %p870_p9, %p864_p6 }
  0x44   :  { %584 = vmatprep.subr.mxu1 %v921_v0  ;;  %308 = vmatprep.subr.bf16.mxu0 %v734_v9  ;;  %v97_v26 = vpack.c.bf16 %v93_v25, %v91_v24  ;;  %v766_v39 = vld [vmem:[#allocation9 + $0x90] ss:$8 sps:$4 sm:$0xff]   ;;  %v767_v40 = vld [vmem:[#allocation9 + $0x84] ss:$8 sps:$4 sm:$0xff]   ;;  %v769_v41 = vld [vmem:[#allocation9 + $0x80] ss:$8 sps:$4 sm:$0xff]   ;;  %v135_v1 = vrot.slane %v1001_v49, %v134_v61 }
  0x45   :  { %v95_v42 = vld [vmem:[#allocation2 + $0x28] sm:$0xff] }
  0x46   :  { %332 = vmatprep.mubr.bf16.mxu0 %v97_v26  ;;  %v99_v44 = vpack.c.bf16 %v95_v42, %v95_v42  ;;  %v1003_v50 = vld [vmem:[#allocation10 + $0x8] sm:$0xff] }
  0x47   :  { %585 = vmatpush1.xpose.msra.mxu1 %v921_v0  ;;  %309 = vmatpush1.bf16.msra.mxu0 %v736_v10  ;;  %v515_v52 = vcombine.low %v1001_v49, %v1003_v50  ;;  %v139_v63 = vrot.slane %v1003_v50, %v134_v61 }
  0x48   :  { %586 = vmatprep.subr.mxu1 %v921_v0  ;;  %310 = vmatprep.subr.bf16.mxu0 %v737_v11 }
  0x49   :  { %v522_v55 = vrot.slane %v515_v52, %v521_v54 }
  0x4b   :  { %587 = vmatpush1.xpose.msra.mxu1 %v921_v0  ;;  %311 = vmatpush1.bf16.msra.mxu0 %v739_v12  ;;  %v523_v56 = vcombine.high %v522_v55, %v522_v55 }
  0x4c   :  { %588 = vmatprep.subr.mxu1 %v921_v0  ;;  %312 = vmatprep.subr.bf16.mxu0 %v740_v13 }
  0x4d   :  { %v530_v57 = vrot.slane %v523_v56, %v521_v54 }
  0x4f   :  { %589 = vmatpush1.xpose.msra.mxu1 %v921_v0  ;;  %313 = vmatpush1.bf16.msra.mxu0 %v742_v19  ;;  %v531_v58 = vcombine.high %v530_v57, %v530_v57 }
  0x50   :  { %590 = vmatprep.subr.mxu1 %v921_v0  ;;  %314 = vmatprep.subr.bf16.mxu0 %v743_v21 }
  0x51   :  { %538 = vst.msk [vmem:[#allocation3 + $0x20] ss:$8 sm:$0x3] %vm535_vm1, %v531_v58 }
  0x53   :  { %591 = vmatpush1.xpose.msra.mxu1 %v921_v0  ;;  %315 = vmatpush1.bf16.msra.mxu0 %v745_v22 }
  0x54   :  { %592 = vmatprep.subr.mxu1 %v921_v0  ;;  %316 = vmatprep.subr.bf16.mxu0 %v746_v23 }
  0x57   :  { %593 = vmatpush1.xpose.msra.mxu1 %v921_v0  ;;  %317 = vmatpush2.bf16.msra.mxu0 %v748_v27 }
  0x58   :  { %594 = vmatprep.subr.mxu1 %v921_v0  ;;  %318 = vmatprep.subr.bf16.mxu0 %v749_v28 }
  0x5b   :  { %595 = vmatpush1.xpose.msra.mxu1 %v921_v0  ;;  %319 = vmatpush2.bf16.msra.mxu0 %v751_v29 }
  0x5c   :  { %596 = vmatprep.subr.mxu1 %v921_v0  ;;  %320 = vmatprep.subr.bf16.mxu0 %v752_v30 }
  0x5f   :  { %597 = vmatpush1.xpose.msra.mxu1 %v921_v0  ;;  %321 = vmatpush2.bf16.msra.mxu0 %v754_v31 }
  0x60   :  { %598 = vmatprep.subr.mxu1 %v921_v0  ;;  %322 = vmatprep.subr.bf16.mxu0 %v755_v32 }
  0x63   :  { %599 = vmatpush1.xpose.msra.mxu1 %v921_v0  ;;  %323 = vmatpush2.bf16.msra.mxu0 %v757_v33 }
  0x64   :  { %600 = vmatprep.subr.mxu1 %v921_v0  ;;  %324 = vmatprep.subr.bf16.mxu0 %v758_v34 }
  0x67   :  { %601 = vmatpush1.xpose.msra.mxu1 %v921_v0  ;;  %325 = vmatpush2.bf16.msra.mxu0 %v760_v35 }
  0x68   :  { %326 = vmatprep.subr.bf16.mxu0 %v761_v36  ;;  %v545_v36 = vld [vmem:[#allocation3 + $0x28] sm:$0xff] }
  0x69   :  { %602 = vmatprep.subr.mxu1 %v545_v36 }
  0x6b   :  { %327 = vmatpush2.bf16.msra.mxu0 %v763_v37  ;;  %v544_v37 = vld [vmem:[#allocation3 + $0x20] sm:$0xff] }
  0x6c   :  { %328 = vmatprep.subr.bf16.mxu0 %v764_v38  ;;  %603 = vmatpush1.xpose.msra.mxu1 %v544_v37 }
  0x6f   :  { %329 = vmatpush2.bf16.msra.mxu0 %v766_v39 }
  0x70   :  { %330 = vmatprep.subr.bf16.mxu0 %v767_v40 }
  0x73   :  { %331 = vmatpush2.bf16.msra.mxu0 %v769_v41 }
  0x76   :  { %333 = vmatmul.mubr.bf16.vlgmr.msra.gmra.mxu0 %v96_v43 }
  0x77   :  { %342 = vmatprep.mubr.bf16.mxu0 %v99_v44 }
  0x7e   :  { %343 = vmatmul.mubr.bf16.gmra.mxu0 %v98_v45 }
 0x136   :  { %v334_v59 = vpop.f32.mrf.mxu0 }
 0x137   :  { %v335_v11 = vadd.f32 %v334_v59, %v135_v1 }
 0x138   :  { %v336_v60 = vpop.f32.mrf.mxu0 }
 0x139   :  { %v337_v6 = vadd.f32 %v336_v60, %v139_v63  ;;  %v357_v23 = vmul.f32 0.01, %v335_v11  ;;  %vm351_vm7 = vcmp.ge.f32.partialorder %v335_v11, 0.0 }
 0x13a   :  { %v338_v62 = vpop.f32.mrf.mxu0 }
 0x13b   :  { %v339_v4 = vadd.f32 %v338_v62, %v135_v1  ;;  %v358_v17 = vmul.f32 0.01, %v337_v6  ;;  %vm352_vm6 = vcmp.ge.f32.partialorder %v337_v6, 0.0  ;;  %v1035_v30 = vsel %vm351_vm7, %v335_v11, %v357_v23 }
 0x13c   :  { %v340_v0 = vpop.f32.mrf.mxu0  ;;  %v378_v34 = vmul.f32 %v1035_v30, %v1035_v30 }
 0x13d   :  { %v341_v2 = vadd.f32 %v340_v0, %v139_v63  ;;  %v359_v13 = vmul.f32 0.01, %v339_v4  ;;  %vm353_vm5 = vcmp.ge.f32.partialorder %v339_v4, 0.0  ;;  %v1029_v27 = vsel %vm352_vm6, %v337_v6, %v358_v17 }
 0x13e   :  { %v344_v3 = vpop.f32.mrf.mxu0  ;;  %v379_v32 = vmul.f32 %v1029_v27, %v1029_v27  ;;  %v369_v33 = vadd.f32 %v1029_v27, %v1035_v30 }
 0x13f   :  { %v345_v5 = vadd.f32 %v344_v3, %v135_v1  ;;  %v360_v8 = vmul.f32 0.01, %v341_v2  ;;  %vm354_vm3 = vcmp.ge.f32.partialorder %v341_v2, 0.0  ;;  %v1025_v24 = vsel %vm353_vm5, %v339_v4, %v359_v13 }
 0x140   :  { %v346_v7 = vpop.f32.mrf.mxu0  ;;  %v380_v29 = vmul.f32 %v1025_v24, %v1025_v24  ;;  %v384_v35 = vadd.f32 %v379_v32, %v378_v34 }
 0x141   :  { %v361_v9 = vmul.f32 0.01, %v345_v5  ;;  %v347_v10 = vadd.f32 %v346_v7, %v139_v63  ;;  %vm355_vm2 = vcmp.ge.f32.partialorder %v345_v5, 0.0  ;;  %v1017_v19 = vsel %vm354_vm3, %v341_v2, %v360_v8 }
 0x142   :  { %v348_v12 = vpop.f32.mrf.mxu0  ;;  %v381_v26 = vmul.f32 %v1017_v19, %v1017_v19  ;;  %v372_v28 = vadd.f32 %v1017_v19, %v1025_v24 }
 0x143   :  { %v362_v14 = vmul.f32 0.01, %v347_v10  ;;  %vm356_vm4 = vcmp.ge.f32.partialorder %v347_v10, 0.0  ;;  %v1013_v15 = vsel %vm355_vm2, %v345_v5, %v361_v9 }
 0x144   :  { %v349_v16 = vpop.f32.mrf.mxu0  ;;  %v382_v21 = vmul.f32 %v1013_v15, %v1013_v15  ;;  %v387_v31 = vadd.f32 %v381_v26, %v380_v29 }
 0x145   :  { %v1015_v18 = vsel %vm356_vm4, %v347_v10, %v362_v14  ;;  %v449_v16 = vsub.s32 1, %v1005_v51 }
 0x146   :  { %v375_v20 = vadd.f32 %v1015_v18, %v1013_v15  ;;  %v383_v22 = vmul.f32 %v1015_v18, %v1015_v18 }
 0x148   :  { %376 = vadd.xlane.f32.xlu0 %v375_v20  ;;  %v390_v25 = vadd.f32 %v383_v22, %v382_v21  ;;  %v463_v20 = vsub.s32 2, %v1005_v51  ;;  %v450_v21 = vrot.slane %v1001_v49, %v449_v16  ;;  %v454_v22 = vrot.slane %v1003_v50, %v449_v16 }
 0x14a   :  { %391 = vadd.xlane.f32.xlu1 %v390_v25  ;;  %v468_v29 = vrot.slane %v1003_v50, %v463_v20 }
 0x14c   :  { %373 = vadd.xlane.f32.xlu0 %v372_v28  ;;  %v464_v28 = vrot.slane %v1001_v49, %v463_v20 }
 0x14e   :  { %388 = vadd.xlane.f32.xlu1 %v387_v31 }
 0x150   :  { %370 = vadd.xlane.f32.xlu0 %v369_v33 }
 0x152   :  { %385 = vadd.xlane.f32.xlu1 %v384_v35 }
 0x1d1   :  { %v377_v38 = vpop.xlane.xlu0 %376 }
 0x1d2   :  { %v395_v39 = vmul.f32 0.005, %v377_v38 }
 0x1d3   :  { %v392_v41 = vpop.xlane.xlu1 %391 }
 0x1d4   :  { %v398_v40 = vmul.f32 200.0, %v395_v39  ;;  %v439_v23 = vsub.f32 %v1013_v15, %v395_v39  ;;  %v440_v25 = vsub.f32 %v1015_v18, %v395_v39 }
 0x1d5   :  { %v374_v42 = vpop.xlane.xlu0 %373 }
 0x1d6   :  { %v401_v43 = vmul.f32 %v398_v40, %v395_v39  ;;  %v1043_v44 = vmul.f32 0.005, %v374_v42 }
 0x1d7   :  { %v389_v54 = vpop.xlane.xlu1 %388 }
 0x1d8   :  { %v404_v45 = vsub.f32 %v392_v41, %v401_v43  ;;  %v397_v46 = vmul.f32 200.0, %v1043_v44  ;;  %v437_v35 = vsub.f32 %v1025_v24, %v1043_v44  ;;  %v438_v36 = vsub.f32 %v1017_v19, %v1043_v44 }
 0x1d9   :  { %v371_v47 = vpop.xlane.xlu0 %370 }
 0x1da   :  { %v407_v48 = vmul.f32 0.0050251256, %v404_v45  ;;  %v400_v52 = vmul.f32 %v397_v46, %v1043_v44  ;;  %v1047_v53 = vmul.f32 0.005, %v371_v47 }
 0x1db   :  { %v386_v59 = vpop.xlane.xlu1 %385 }
 0x1dc   :  { %771 = vrsqrt.f32 %v407_v48  ;;  %v403_v55 = vsub.f32 %v389_v54, %v400_v52  ;;  %v396_v56 = vmul.f32 200.0, %v1047_v53  ;;  %vm424_vm8 = vcmp.eq.f32.partialorder %v407_v48, inf }
 0x1dd   :  { %v427_v0 = vand.u32 2147483648, %v407_v48  ;;  %vm426_vm9 = vcmp.eq.f32.partialorder %v407_v48, 0.0  ;;  %v435_v50 = vsub.f32 %v1035_v30, %v1047_v53  ;;  %v436_v42 = vsub.f32 %v1029_v27, %v1047_v53 }
 0x1de   :  { %v406_v57 = vmul.f32 0.0050251256, %v403_v55  ;;  %v399_v58 = vmul.f32 %v396_v56, %v1047_v53 }
 0x1e0   :  { %773 = vrsqrt.f32 %v406_v57  ;;  %v402_v60 = vsub.f32 %v386_v59, %v399_v58  ;;  %vm417_vm10 = vcmp.eq.f32.partialorder %v406_v57, inf  ;;  %v420_v6 = vand.u32 2147483648, %v406_v57 }
 0x1e1   :  { %vm419_vm11 = vcmp.eq.f32.partialorder %v406_v57, 0.0 }
 0x1e2   :  { %v405_v61 = vmul.f32 0.0050251256, %v402_v60 }
 0x1e4   :  { %775 = vrsqrt.f32 %v405_v61  ;;  %vm410_vm12 = vcmp.eq.f32.partialorder %v405_v61, inf  ;;  %v413_v12 = vand.u32 2147483648, %v405_v61  ;;  %vm412_vm13 = vcmp.eq.f32.partialorder %v405_v61, 0.0 }
 0x1e9   :  { %v772_v62 = vpop.eup %771 }
 0x1ea   :  { %v423_v63 = vmul.f32 %v772_v62, %v407_v48 }
 0x1ec   :  { %v425_v1 = vsel %vm424_vm8, %v407_v48, %v423_v63 }
 0x1ed   :  { %v428_v2 = vsel %vm426_vm9, %v427_v0, %v425_v1  ;;  %v774_v3 = vpop.eup %773 }
 0x1ee   :  { %v431_v4 = vadd.f32 1e-06, %v428_v2  ;;  %v416_v5 = vmul.f32 %v774_v3, %v406_v57 }
 0x1f0   :  { %777 = vrcp.f32 %v431_v4  ;;  %v418_v7 = vsel %vm417_vm10, %v406_v57, %v416_v5 }
 0x1f1   :  { %v421_v8 = vsel %vm419_vm11, %v420_v6, %v418_v7  ;;  %v776_v9 = vpop.eup %775 }
 0x1f2   :  { %v430_v10 = vadd.f32 1e-06, %v421_v8  ;;  %v409_v11 = vmul.f32 %v776_v9, %v405_v61 }
 0x1f4   :  { %779 = vrcp.f32 %v430_v10  ;;  %v411_v13 = vsel %vm410_vm12, %v405_v61, %v409_v11 }
 0x1f5   :  { %v414_v14 = vsel %vm412_vm13, %v413_v12, %v411_v13 }
 0x1f6   :  { %v429_v17 = vadd.f32 1e-06, %v414_v14 }
 0x1f8   :  { %781 = vrcp.f32 %v429_v17 }
 0x1fd   :  { %v778_v26 = vpop.eup %777 }
 0x1fe   :  { %v445_v31 = vmul.f32 %v778_v26, %v439_v23  ;;  %v446_v32 = vmul.f32 %v778_v26, %v440_v25 }
 0x200   :  { %v459_v33 = vmul.f32 %v450_v21, %v445_v31  ;;  %v460_v34 = vmul.f32 %v454_v22, %v446_v32 }
 0x201   :  { %v780_v37 = vpop.eup %779 }
 0x202   :  { %v474_v38 = vadd.f32 %v468_v29, %v460_v34  ;;  %v473_v15 = vadd.f32 %v464_v28, %v459_v33  ;;  %v443_v40 = vmul.f32 %v780_v37, %v437_v35  ;;  %v444_v18 = vmul.f32 %v780_v37, %v438_v36 }
 0x204   :  { %604 = vmatprep.subr.mxu1 %v474_v38  ;;  %v457_v39 = vmul.f32 %v450_v21, %v443_v40  ;;  %v458_v41 = vmul.f32 %v454_v22, %v444_v18 }
 0x205   :  { %605 = vmatpush1.xpose.msra.mxu1 %v473_v15  ;;  %v782_v43 = vpop.eup %781 }
 0x206   :  { %v472_v24 = vadd.f32 %v468_v29, %v458_v41  ;;  %v471_v45 = vadd.f32 %v464_v28, %v457_v39  ;;  %v442_v46 = vmul.f32 %v782_v43, %v436_v42  ;;  %v441_v19 = vmul.f32 %v782_v43, %v435_v50 }
 0x208   :  { %606 = vmatprep.subr.mxu1 %v472_v24  ;;  %v456_v44 = vmul.f32 %v454_v22, %v442_v46  ;;  %v455_v47 = vmul.f32 %v450_v21, %v441_v19 }
 0x209   :  { %607 = vmatpush1.xpose.msra.mxu1 %v471_v45 }
 0x20a   :  { %v470_v48 = vadd.f32 %v468_v29, %v456_v44  ;;  %v469_v52 = vadd.f32 %v464_v28, %v455_v47 }
 0x20c   :  { %640 = vmatprep.mubr.f32.mxu1 %v470_v48  ;;  %476 = vst [vmem:[#allocation12 + $0x8] sm:$0xff] %v470_v48  ;;  %475 = vst [vmem:[#allocation12] sm:$0xff] %v469_v52 }
 0x20d   :  { %641 = vmatmul.mubr.f32.vlgmr.msra.gmra.mxu1 %v469_v52 }
 0x20e   :  { %874 = shalt.err (!%p871_p10)
}
 0x20f   :  { %656 = dma.vmem_to_hbm [thread:$0]  %s654_s3, 256, %s1079_s4, [#allocation6]   ;;  %v574_v27 = vsub.s32 4, %v1005_v51 }
 0x210   :  { %s924_s18 = smov [#allocation13]  }
 0x211   :  { %v575_v30 = vrot.slane %v1001_v49, %v574_v27  ;;  %s663_s19 = sshll.u32 %s924_s18, 4  ;;  %s664_s19 = int_to_ptr.vmem [resolvable:$true] %s663_s19 }
 0x212   :  { %s883_s20 = scalar_lea.vmem %s664_s19, 128  ;;  %p888_p12 = scmp.lt.s32.totalorder %s664_s19, %s664_s19 }
 0x213   :  { %p884_p11 = scmp.ne.s32.totalorder %s664_s19, %s883_s20  ;;  %p889_p13 = scmp.lt.s32.totalorder %s883_s20, %s883_s20 }
 0x215   :  { %p890_p0 = por %p889_p13, %p888_p12 }
 0x217   :  { %p891_p1 = pnand %p890_p0, %p884_p11 }
 0x2cd   :  { %v642_v53 = vpop.f32.mrf.mxu1 }
 0x2ce   :  { %v643_v54 = vadd.f32 %v642_v53, %v575_v30 }
 0x2cf   :  { %v644_v55 = vpop.f32.mrf.mxu1 }
 0x2d0   :  { %646 = vst [vmem:[#allocation13] sm:$0xff] %v643_v54 }
 0x2d1   :  { %894 = shalt.err (!%p891_p1)
}
 0x2d2   :  { %666 = dma.vmem_to_hbm [thread:$0]  %s664_s19, 128, %s1080_s5, [#allocation14]  }
 0x2d3   :  { %909 = dma.done.wait [#allocation6], 256  }
 0x2d4   :  { %910 = vsyncadd [#allocation6], 4294967040 }
 0x2d5   :  { %911 = dma.done.wait [#allocation14], 128  }
 0x2d6   :  { %912 = vsyncadd [#allocation14], 4294967168 }
 0x2d7   :  { %673 = vsyncpa [#allocation5], 1 }
 0x2d8   :  { %674 = vsyncpa [#allocation8], 1 }
 0x2d9   :  { %675 = vsyncpa [#allocation11], 1 }
 0x2da   :  { %676 = vsyncpa [#allocation6], 1 }
 0x2db   :  { %677 = vsyncpa [#allocation14], 1 }

</bundles_post_ra>
